<compile_context>
chip_gen: v5e
topology: v5e:2x2
jax: 0.10.0
libtpu: 0.0.40
codegen_flags: <defaults>
</compile_context>

<pallas_src>
import functools

import jax
import jax.numpy as jnp
from jax.experimental import pallas as pl
from jax.experimental.pallas import tpu as pltpu


D_IN = 28 * 28     # 784
HIDDEN = 64
D_OUT = 10


def mlp_kernel(x_ref, w1_ref, b1_ref, w2_ref, b2_ref,
               w3_ref, b3_ref, w4_ref, b4_ref, o_ref):
    # One batch tile per grid step. Weights/biases are VMEM-resident
    # (constant index_map). x arrives f32 and is cast to bf16 here (no extra
    # HBM pass). bf16 x bf16 matmuls with f32 accumulation; elementwise math
    # in f32. Rows of a partial (out-of-bounds) tile may contain garbage but
    # their stores are masked by Pallas, so results stay correct.
    x = x_ref[...].astype(jnp.bfloat16)                        # (Bt, 784)

    h = jnp.dot(x, w1_ref[...], preferred_element_type=jnp.float32)
    h = jnp.maximum(h + b1_ref[...], 0.0)

    h = jnp.dot(h.astype(jnp.bfloat16), w2_ref[...],
                preferred_element_type=jnp.float32)
    h = jnp.maximum(h + b2_ref[...], 0.0)

    h = jnp.dot(h.astype(jnp.bfloat16), w3_ref[...],
                preferred_element_type=jnp.float32)
    h = jnp.maximum(h + b3_ref[...], 0.0)

    logits = jnp.dot(h.astype(jnp.bfloat16), w4_ref[...],
                     preferred_element_type=jnp.float32) + b4_ref[...]

    # log_softmax along the feature axis (PyTorch dim=1), computed in f32.
    m = jnp.max(logits, axis=-1, keepdims=True)
    shifted = logits - m
    lse = jnp.log(jnp.sum(jnp.exp(shifted), axis=-1, keepdims=True))
    o_ref[...] = (shifted - lse).astype(o_ref.dtype)


def _round_up(x, m):
    return ((x + m - 1) // m) * m


@functools.partial(jax.jit, static_argnames=("block_b",))
def net_forward(x, params, *, block_b=1024):
    (w1, b1, w2, b2, w3, b3, w4, b4) = params
    batch, d_in = x.shape
    n_out = w4.shape[1]

    # Weights to bf16 (tiny, resident, negligible traffic); biases stay f32.
    # x is left untouched (f32, 784-wide) -- cast happens inside the kernel.
    w1, w2, w3, w4 = (w.astype(jnp.bfloat16) for w in (w1, w2, w3, w4))
    b1, b2, b3, b4 = (b.astype(jnp.float32) for b in (b1, b2, b3, b4))

    # Batch tile: big enough to amortize per-grid-step overhead, capped so
    # the grid has >= 2 tiles when the batch allows (v7x has 2 TensorCores),
    # and never wider than the (8-rounded) batch. Multiple of 8 sublanes.
    b_tile = min(_round_up(block_b, 16),
                 _round_up(pl.cdiv(batch, 2), 16),
                 _round_up(batch, 8))
    b_tile = max(b_tile, 8)
    grid = (pl.cdiv(batch, b_tile),)

    # Constant index_map -> block fetched once, stays VMEM-resident.
    resident = lambda a: pl.BlockSpec(a.shape, lambda i: (0,) * a.ndim)

    # VMEM budget: double-buffered x tiles dominate (2 * b_tile * 784 * 4B);
    # give ~1.5x headroom plus slack for output buffers + resident weights.
    # (b_tile=1024 -> ~16 MiB limit; b_tile=2048 -> ~23 MiB; <= 32 MiB cap
    # keeps us inside v7x's scoped default and well under v5e's 128 MiB phys.)
    vmem_limit_bytes = min(32 << 20,
                           max(16 << 20, 3 * b_tile * d_in * 4 + (4 << 20)))

    flops = 2 * batch * (d_in * HIDDEN + HIDDEN * HIDDEN * 2 + HIDDEN * n_out)
    bytes_accessed = (x.size * x.dtype.itemsize
                      + sum(a.size * a.dtype.itemsize
                            for a in (w1, b1, w2, b2, w3, b3, w4, b4))
                      + batch * n_out * 4)
    cost = pl.CostEstimate(flops=flops,
                           transcendentals=batch * n_out,
                           bytes_accessed=bytes_accessed)

    out = pl.pallas_call(
        mlp_kernel,
        out_shape=jax.ShapeDtypeStruct((batch, n_out), jnp.float32),
        grid=grid,
        in_specs=[pl.BlockSpec((b_tile, d_in), lambda i: (i, 0)),
                  resident(w1), resident(b1),
                  resident(w2), resident(b2),
                  resident(w3), resident(b3),
                  resident(w4), resident(b4)],
        out_specs=pl.BlockSpec((b_tile, n_out), lambda i: (i, 0)),
        compiler_params=pltpu.CompilerParams(
            dimension_semantics=("parallel",),
            vmem_limit_bytes=vmem_limit_bytes),
        cost_estimate=cost,
    )(x, w1, b1, w2, b2, w3, b3, w4, b4)

    return out


def init_params(key):
    """Deterministic init mimicking nn.Linear defaults (uniform +/- 1/sqrt(fan_in))."""
    dims = [(D_IN, HIDDEN), (HIDDEN, HIDDEN), (HIDDEN, HIDDEN), (HIDDEN, D_OUT)]
    params = []
    for fan_in, fan_out in dims:
        kw, kb, key = jax.random.split(key, 3)
        bound = 1.0 / (fan_in ** 0.5)
        w = jax.random.uniform(kw, (fan_in, fan_out), jnp.float32, -bound, bound)
        b = jax.random.uniform(kb, (1, fan_out), jnp.float32, -bound, bound)
        params.extend([w, b])
    return tuple(params)


def reference_forward(x, params):
    (w1, b1, w2, b2, w3, b3, w4, b4) = params
    h = jax.nn.relu(x @ w1 + b1)
    h = jax.nn.relu(h @ w2 + b2)
    h = jax.nn.relu(h @ w3 + b3)
    logits = h @ w4 + b4
    return jax.nn.log_softmax(logits, axis=1)


if __name__ == "__main__":
    key = jax.random.PRNGKey(0)
    kx, kp = jax.random.split(key)
    params = init_params(kp)

    # Small single-tile batch and a ragged multi-tile batch (exercises the
    # cdiv grid, partial-tile masking, and the 2-tile-minimum split).
    for batch in (8, 300):
        kx, sub = jax.random.split(kx)
        x = jax.random.normal(sub, (batch, D_IN), dtype=jnp.float32)

        out = net_forward(x, params)
        jax.block_until_ready(out)

        ref = reference_forward(x, params)
        assert out.shape == (batch, D_OUT)
        # bf16 matmul inputs (f32 accumulation) vs f32 reference -> loose tol.
        assert jnp.allclose(out, ref, atol=2e-2, rtol=2e-2), (
            "max abs err", float(jnp.max(jnp.abs(out - ref))))

    print("KERNEL_OK")
</pallas_src>

<mosaic_0001>
module attributes {stable_mosaic.version = 11 : i64} {
  func.func @mlp_kernel(%arg0: i32, %arg1: memref<8x784xf32, #tpu.memory_space<vmem>>, %arg2: memref<784x64xbf16, #tpu.memory_space<vmem>>, %arg3: memref<1x64xf32, #tpu.memory_space<vmem>>, %arg4: memref<64x64xbf16, #tpu.memory_space<vmem>>, %arg5: memref<1x64xf32, #tpu.memory_space<vmem>>, %arg6: memref<64x64xbf16, #tpu.memory_space<vmem>>, %arg7: memref<1x64xf32, #tpu.memory_space<vmem>>, %arg8: memref<64x10xbf16, #tpu.memory_space<vmem>>, %arg9: memref<1x10xf32, #tpu.memory_space<vmem>>, %arg10: memref<8x10xf32, #tpu.memory_space<vmem>>) attributes {dimension_semantics = [#tpu.dimension_semantics<parallel>], iteration_bounds = array<i64: 1>, scalar_prefetch = 0 : i64, scratch_operands = 0 : i64, tpu.core_type = #tpu.core_type<tc>, window_params = [{transform_indices = @transform_0, window_bounds = array<i64: 8, 784>}, {pipeline_mode = #tpu.pipeline_mode<synchronous>, transform_indices = @transform_1, window_bounds = array<i64: 784, 64>}, {pipeline_mode = #tpu.pipeline_mode<synchronous>, transform_indices = @transform_2, window_bounds = array<i64: 1, 64>}, {pipeline_mode = #tpu.pipeline_mode<synchronous>, transform_indices = @transform_3, window_bounds = array<i64: 64, 64>}, {pipeline_mode = #tpu.pipeline_mode<synchronous>, transform_indices = @transform_4, window_bounds = array<i64: 1, 64>}, {pipeline_mode = #tpu.pipeline_mode<synchronous>, transform_indices = @transform_5, window_bounds = array<i64: 64, 64>}, {pipeline_mode = #tpu.pipeline_mode<synchronous>, transform_indices = @transform_6, window_bounds = array<i64: 1, 64>}, {pipeline_mode = #tpu.pipeline_mode<synchronous>, transform_indices = @transform_7, window_bounds = array<i64: 64, 10>}, {pipeline_mode = #tpu.pipeline_mode<synchronous>, transform_indices = @transform_8, window_bounds = array<i64: 1, 10>}, {transform_indices = @transform_9, window_bounds = array<i64: 8, 10>}]} {
    %c0 = arith.constant 0 : index
    %c0_0 = arith.constant 0 : index
    %0 = vector.load %arg1[%c0, %c0_0] : memref<8x784xf32, #tpu.memory_space<vmem>>, vector<8x784xf32>
    %1 = arith.truncf %0 : vector<8x784xf32> to vector<8x784xbf16>
    %c0_1 = arith.constant 0 : index
    %c0_2 = arith.constant 0 : index
    %2 = vector.load %arg2[%c0_1, %c0_2] : memref<784x64xbf16, #tpu.memory_space<vmem>>, vector<784x64xbf16>
    %cst = arith.constant dense<0.000000e+00> : vector<8x64xf32>
    %3 = tpu.matmul %1, %2, %cst {dimension_numbers = #tpu.dot_dimension_numbers<[1], [0], [0], [1], [0, 0, 1, 1], [], []>} : vector<8x784xbf16>, vector<784x64xbf16>, vector<8x64xf32> -> vector<8x64xf32>
    %c0_3 = arith.constant 0 : index
    %c0_4 = arith.constant 0 : index
    %4 = vector.load %arg3[%c0_3, %c0_4] : memref<1x64xf32, #tpu.memory_space<vmem>>, vector<1x64xf32>
    %5 = vector.broadcast %4 : vector<1x64xf32> to vector<8x64xf32>
    %6 = arith.addf %3, %5 : vector<8x64xf32>
    %cst_5 = arith.constant 0.000000e+00 : f32
    %7 = vector.broadcast %cst_5 : f32 to vector<8x64xf32>
    %8 = arith.maximumf %6, %7 : vector<8x64xf32>
    %9 = arith.truncf %8 : vector<8x64xf32> to vector<8x64xbf16>
    %c0_6 = arith.constant 0 : index
    %c0_7 = arith.constant 0 : index
    %10 = vector.load %arg4[%c0_6, %c0_7] : memref<64x64xbf16, #tpu.memory_space<vmem>>, vector<64x64xbf16>
    %cst_8 = arith.constant dense<0.000000e+00> : vector<8x64xf32>
    %11 = tpu.matmul %9, %10, %cst_8 {dimension_numbers = #tpu.dot_dimension_numbers<[1], [0], [0], [1], [0, 0, 1, 1], [], []>} : vector<8x64xbf16>, vector<64x64xbf16>, vector<8x64xf32> -> vector<8x64xf32>
    %c0_9 = arith.constant 0 : index
    %c0_10 = arith.constant 0 : index
    %12 = vector.load %arg5[%c0_9, %c0_10] : memref<1x64xf32, #tpu.memory_space<vmem>>, vector<1x64xf32>
    %13 = vector.broadcast %12 : vector<1x64xf32> to vector<8x64xf32>
    %14 = arith.addf %11, %13 : vector<8x64xf32>
    %cst_11 = arith.constant 0.000000e+00 : f32
    %15 = vector.broadcast %cst_11 : f32 to vector<8x64xf32>
    %16 = arith.maximumf %14, %15 : vector<8x64xf32>
    %17 = arith.truncf %16 : vector<8x64xf32> to vector<8x64xbf16>
    %c0_12 = arith.constant 0 : index
    %c0_13 = arith.constant 0 : index
    %18 = vector.load %arg6[%c0_12, %c0_13] : memref<64x64xbf16, #tpu.memory_space<vmem>>, vector<64x64xbf16>
    %cst_14 = arith.constant dense<0.000000e+00> : vector<8x64xf32>
    %19 = tpu.matmul %17, %18, %cst_14 {dimension_numbers = #tpu.dot_dimension_numbers<[1], [0], [0], [1], [0, 0, 1, 1], [], []>} : vector<8x64xbf16>, vector<64x64xbf16>, vector<8x64xf32> -> vector<8x64xf32>
    %c0_15 = arith.constant 0 : index
    %c0_16 = arith.constant 0 : index
    %20 = vector.load %arg7[%c0_15, %c0_16] : memref<1x64xf32, #tpu.memory_space<vmem>>, vector<1x64xf32>
    %21 = vector.broadcast %20 : vector<1x64xf32> to vector<8x64xf32>
    %22 = arith.addf %19, %21 : vector<8x64xf32>
    %cst_17 = arith.constant 0.000000e+00 : f32
    %23 = vector.broadcast %cst_17 : f32 to vector<8x64xf32>
    %24 = arith.maximumf %22, %23 : vector<8x64xf32>
    %25 = arith.truncf %24 : vector<8x64xf32> to vector<8x64xbf16>
    %c0_18 = arith.constant 0 : index
    %c0_19 = arith.constant 0 : index
    %26 = vector.load %arg8[%c0_18, %c0_19] : memref<64x10xbf16, #tpu.memory_space<vmem>>, vector<64x10xbf16>
    %cst_20 = arith.constant dense<0.000000e+00> : vector<8x10xf32>
    %27 = tpu.matmul %25, %26, %cst_20 {dimension_numbers = #tpu.dot_dimension_numbers<[1], [0], [0], [1], [0, 0, 1, 1], [], []>} : vector<8x64xbf16>, vector<64x10xbf16>, vector<8x10xf32> -> vector<8x10xf32>
    %c0_21 = arith.constant 0 : index
    %c0_22 = arith.constant 0 : index
    %28 = vector.load %arg9[%c0_21, %c0_22] : memref<1x10xf32, #tpu.memory_space<vmem>>, vector<1x10xf32>
    %29 = vector.broadcast %28 : vector<1x10xf32> to vector<8x10xf32>
    %30 = arith.addf %27, %29 : vector<8x10xf32>
    %cst_23 = arith.constant dense<0xFF800000> : vector<8xf32>
    %31 = vector.multi_reduction <maximumf>, %30, %cst_23 [1] : vector<8x10xf32> to vector<8xf32>
    %32 = vector.shape_cast %31 : vector<8xf32> to vector<8x1xf32>
    %33 = vector.broadcast %32 : vector<8x1xf32> to vector<8x10xf32>
    %34 = arith.subf %30, %33 : vector<8x10xf32>
    %35 = math.exp %34 : vector<8x10xf32>
    %cst_24 = arith.constant dense<0.000000e+00> : vector<8xf32>
    %36 = vector.multi_reduction <add>, %35, %cst_24 [1] : vector<8x10xf32> to vector<8xf32>
    %37 = vector.shape_cast %36 : vector<8xf32> to vector<8x1xf32>
    %38 = math.log %37 : vector<8x1xf32>
    %39 = vector.broadcast %38 : vector<8x1xf32> to vector<8x10xf32>
    %40 = arith.subf %34, %39 : vector<8x10xf32>
    %c0_25 = arith.constant 0 : index
    %c0_26 = arith.constant 0 : index
    %41 = vector.load %arg10[%c0_25, %c0_26] : memref<8x10xf32, #tpu.memory_space<vmem>>, vector<8x10xf32>
    tpu.vector_store %arg10[%c0_25, %c0_26], %40 {strides = array<i32>} : memref<8x10xf32, #tpu.memory_space<vmem>>, vector<8x10xf32>,
    return
  }
  func.func @transform_0(%arg0: i32) -> (i32, i32) {
    %c0_i32 = arith.constant 0 : i32
    %c0_i32_0 = arith.constant 0 : i32
    return %arg0, %c0_i32 : i32, i32
  }
  func.func @transform_1(%arg0: i32) -> (i32, i32) {
    %c0_i32 = arith.constant 0 : i32
    %c0_i32_0 = arith.constant 0 : i32
    %c0_i32_1 = arith.constant 0 : i32
    return %c0_i32, %c0_i32_0 : i32, i32
  }
  func.func @transform_2(%arg0: i32) -> (i32, i32) {
    %c0_i32 = arith.constant 0 : i32
    %c0_i32_0 = arith.constant 0 : i32
    %c0_i32_1 = arith.constant 0 : i32
    return %c0_i32, %c0_i32_0 : i32, i32
  }
  func.func @transform_3(%arg0: i32) -> (i32, i32) {
    %c0_i32 = arith.constant 0 : i32
    %c0_i32_0 = arith.constant 0 : i32
    %c0_i32_1 = arith.constant 0 : i32
    return %c0_i32, %c0_i32_0 : i32, i32
  }
  func.func @transform_4(%arg0: i32) -> (i32, i32) {
    %c0_i32 = arith.constant 0 : i32
    %c0_i32_0 = arith.constant 0 : i32
    %c0_i32_1 = arith.constant 0 : i32
    return %c0_i32, %c0_i32_0 : i32, i32
  }
  func.func @transform_5(%arg0: i32) -> (i32, i32) {
    %c0_i32 = arith.constant 0 : i32
    %c0_i32_0 = arith.constant 0 : i32
    %c0_i32_1 = arith.constant 0 : i32
    return %c0_i32, %c0_i32_0 : i32, i32
  }
  func.func @transform_6(%arg0: i32) -> (i32, i32) {
    %c0_i32 = arith.constant 0 : i32
    %c0_i32_0 = arith.constant 0 : i32
    %c0_i32_1 = arith.constant 0 : i32
    return %c0_i32, %c0_i32_0 : i32, i32
  }
  func.func @transform_7(%arg0: i32) -> (i32, i32) {
    %c0_i32 = arith.constant 0 : i32
    %c0_i32_0 = arith.constant 0 : i32
    %c0_i32_1 = arith.constant 0 : i32
    return %c0_i32, %c0_i32_0 : i32, i32
  }
  func.func @transform_8(%arg0: i32) -> (i32, i32) {
    %c0_i32 = arith.constant 0 : i32
    %c0_i32_0 = arith.constant 0 : i32
    %c0_i32_1 = arith.constant 0 : i32
    return %c0_i32, %c0_i32_0 : i32, i32
  }
  func.func @transform_9(%arg0: i32) -> (i32, i32) {
    %c0_i32 = arith.constant 0 : i32
    %c0_i32_0 = arith.constant 0 : i32
    return %arg0, %c0_i32 : i32, i32
  }
}

</mosaic_0001>

<bundles_post_ra>
// kernel: net_forward.1
= control target key start
LH: loop header
LB: loop body
LE: loop exit
PB: predicated region body
PF: predicated region fallthrough
CT: control target
= control target key end

     0   :  { %s1352_s0 = inlined_call_operand.vmem [shape: f32[8,784], index: 0, kind: input, shape index: {}]   ;;  %s1353_s1 = inlined_call_operand.vmem [shape: bf16[784,64], index: 1, kind: input, shape index: {}]   ;;  %s1354_s2 = inlined_call_operand.vmem [shape: f32[1,64], index: 2, kind: input, shape index: {}]   ;;  %s1355_s3 = inlined_call_operand.vmem [shape: bf16[64,64], index: 3, kind: input, shape index: {}]   ;;  %s1356_s4 = inlined_call_operand.vmem [shape: f32[1,64], index: 4, kind: input, shape index: {}]   ;;  %s1357_s5 = inlined_call_operand.vmem [shape: bf16[64,64], index: 5, kind: input, shape index: {}]   ;;  %s1358_s6 = inlined_call_operand.vmem [shape: f32[1,64], index: 6, kind: input, shape index: {}]   ;;  %s1359_s7 = inlined_call_operand.vmem [shape: bf16[64,10], index: 7, kind: input, shape index: {}]   ;;  %s1360_s8 = inlined_call_operand.vmem [shape: f32[1,10], index: 8, kind: input, shape index: {}]   ;;  %s1361_s9 = inlined_call_operand.hbm [shape: f32[8,10], index: 9, kind: output, shape index: {}]  }
   0x1   :  { %v987_v0 = vld [vmem:[%s1353_s1 + $0x38] sm:$0xff]  ;;  %v986_v3 = vld [vmem:[%s1353_s1 + $0x30] sm:$0xff]  ;;  %v985_v8 = vld [vmem:[%s1353_s1 + $0x28] sm:$0xff] }
   0x2   :  { %v995_v1 = vld [vmem:[%s1353_s1 + $0x78] sm:$0xff]  ;;  %448 = vmatpush.bf16.msra.mxu0 %v987_v0  ;;  %v994_v4 = vld [vmem:[%s1353_s1 + $0x70] sm:$0xff]  ;;  %v993_v9 = vld [vmem:[%s1353_s1 + $0x68] sm:$0xff] }
   0x3   :  { %v1003_v2 = vld [vmem:[%s1353_s1 + $0xb8] sm:$0xff]  ;;  %461 = vmatpush.bf16.msra.mxu1 %v995_v1  ;;  %v1002_v5 = vld [vmem:[%s1353_s1 + $0xb0] sm:$0xff]  ;;  %v1001_v10 = vld [vmem:[%s1353_s1 + $0xa8] sm:$0xff] }
   0x4   :  { %474 = vmatpush.bf16.msra.mxu2 %v1003_v2  ;;  %v1011_v6 = vld [vmem:[%s1353_s1 + $0xf8] sm:$0xff]  ;;  %v1010_v7 = vld [vmem:[%s1353_s1 + $0xf0] sm:$0xff]  ;;  %v1009_v11 = vld [vmem:[%s1353_s1 + $0xe8] sm:$0xff] }
   0x5   :  { %487 = vmatpush.bf16.msra.mxu3 %v1011_v6  ;;  %v984_v12 = vld [vmem:[%s1353_s1 + $0x20] sm:$0xff]  ;;  %v983_v16 = vld [vmem:[%s1353_s1 + $0x18] sm:$0xff]  ;;  %v982_v20 = vld [vmem:[%s1353_s1 + $0x10] sm:$0xff] }
   0x6   :  { %449 = vmatpush.bf16.msra.mxu0 %v986_v3  ;;  %v992_v13 = vld [vmem:[%s1353_s1 + $0x60] sm:$0xff]  ;;  %v991_v17 = vld [vmem:[%s1353_s1 + $0x58] sm:$0xff]  ;;  %v990_v21 = vld [vmem:[%s1353_s1 + $0x50] sm:$0xff] }
   0x7   :  { %462 = vmatpush.bf16.msra.mxu1 %v994_v4  ;;  %v1000_v14 = vld [vmem:[%s1353_s1 + $0xa0] sm:$0xff]  ;;  %v999_v18 = vld [vmem:[%s1353_s1 + $0x98] sm:$0xff] }
   0x8   :  { %475 = vmatpush.bf16.msra.mxu2 %v1002_v5  ;;  %v1008_v15 = vld [vmem:[%s1353_s1 + $0xe0] sm:$0xff]  ;;  %v1007_v19 = vld [vmem:[%s1353_s1 + $0xd8] sm:$0xff] }
   0x9   :  { %488 = vmatpush.bf16.msra.mxu3 %v1010_v7 }
   0xa   :  { %450 = vmatpush.bf16.msra.mxu0 %v985_v8 }
   0xb   :  { %463 = vmatpush.bf16.msra.mxu1 %v993_v9 }
   0xc   :  { %476 = vmatpush.bf16.msra.mxu2 %v1001_v10 }
   0xd   :  { %489 = vmatpush.bf16.msra.mxu3 %v1009_v11 }
   0xe   :  { %451 = vmatpush.bf16.msra.mxu0 %v984_v12 }
   0xf   :  { %464 = vmatpush.bf16.msra.mxu1 %v992_v13 }
  0x10   :  { %477 = vmatpush.bf16.msra.mxu2 %v1000_v14 }
  0x11   :  { %490 = vmatpush.bf16.msra.mxu3 %v1008_v15 }
  0x12   :  { %452 = vmatpush.bf16.msra.mxu0 %v983_v16 }
  0x13   :  { %465 = vmatpush.bf16.msra.mxu1 %v991_v17 }
  0x14   :  { %14 = vsyncpa [#allocation3], 0  ;;  %478 = vmatpush.bf16.msra.mxu2 %v999_v18  ;;  %v998_v22 = vld [vmem:[%s1353_s1 + $0x90] sm:$0xff]  ;;  %v981_v24 = vld [vmem:[%s1353_s1 + $0x8] sm:$0xff]  ;;  %vm444_vm0 = vcmask 130048   ;;  %vm577_vm1 = vcmask 523264  }
  0x15   :  { %491 = vmatpush.bf16.msra.mxu3 %v1007_v19  ;;  %v1006_v23 = vld [vmem:[%s1353_s1 + $0xd0] sm:$0xff]  ;;  %v989_v25 = vld [vmem:[%s1353_s1 + $0x48] sm:$0xff]  ;;  %v980_v27 = vld [vmem:[%s1353_s1] sm:$0xff]  ;;  %vm702_vm2 = vcmask 80896  }
  0x16   :  { %453 = vmatpush.bf16.msra.mxu0 %v982_v20  ;;  %v997_v26 = vld [vmem:[%s1353_s1 + $0x88] sm:$0xff]  ;;  %v988_v29 = vld [vmem:[%s1353_s1 + $0x40] sm:$0xff]  ;;  %v1019_v32 = vld [vmem:[%s1353_s1 + $0x138] sm:$0xff] }
  0x17   :  { %466 = vmatpush.bf16.msra.mxu1 %v990_v21  ;;  %v1005_v28 = vld [vmem:[%s1353_s1 + $0xc8] sm:$0xff]  ;;  %v34_v30 = vld [vmem:[%s1352_s0] sm:$0xff]  ;;  %v1027_v33 = vld [vmem:[%s1353_s1 + $0x178] sm:$0xff] }
  0x18   :  { %479 = vmatpush.bf16.msra.mxu2 %v998_v22  ;;  %v35_v31 = vld [vmem:[%s1352_s0 + $0x8] sm:$0xff]  ;;  %v996_v34 = vld [vmem:[%s1353_s1 + $0x80] sm:$0xff]  ;;  %v36_v35 = vld [vmem:[%s1352_s0 + $0x10] sm:$0xff]  ;;  %v41_v36 = vpack.c.bf16 %v34_v30, %v34_v30 }
  0x19   :  { %492 = vmatpush.bf16.msra.mxu3 %v1006_v23  ;;  %v42_v37 = vpack.c.bf16 %v35_v31, %v35_v31  ;;  %v1004_v38 = vld [vmem:[%s1353_s1 + $0xc0] sm:$0xff]  ;;  %v37_v40 = vld [vmem:[%s1352_s0 + $0x18] sm:$0xff]  ;;  %v1018_v41 = vld [vmem:[%s1353_s1 + $0x130] sm:$0xff]  ;;  %v43_v43 = vpack.c.bf16 %v36_v35, %v36_v35 }
  0x1a   :  { %454 = vmatpush.bf16.msra.mxu0 %v981_v24  ;;  %v1028_v39 = vld [vmem:[%s1353_s1 + $0x180] sm:$0xff]  ;;  %v1026_v42 = vld [vmem:[%s1353_s1 + $0x170] sm:$0xff]  ;;  %v44_v44 = vpack.c.bf16 %v37_v40, %v37_v40  ;;  %v1017_v45 = vld [vmem:[%s1353_s1 + $0x128] sm:$0xff] }
  0x1b   :  { %467 = vmatpush.bf16.msra.mxu1 %v989_v25  ;;  %v1025_v46 = vld [vmem:[%s1353_s1 + $0x168] sm:$0xff]  ;;  %v1016_v47 = vld [vmem:[%s1353_s1 + $0x120] sm:$0xff]  ;;  %v1015_v49 = vld [vmem:[%s1353_s1 + $0x118] sm:$0xff] }
  0x1c   :  { %480 = vmatpush.bf16.msra.mxu2 %v997_v26  ;;  %v1024_v48 = vld [vmem:[%s1353_s1 + $0x160] sm:$0xff]  ;;  %v1023_v50 = vld [vmem:[%s1353_s1 + $0x158] sm:$0xff]  ;;  %v40_v51 = vld [vmem:[%s1352_s0 + $0x30] sm:$0xff] }
  0x1d   :  { %493 = vmatpush.bf16.msra.mxu3 %v1005_v28  ;;  %v1014_v52 = vld [vmem:[%s1353_s1 + $0x110] sm:$0xff]  ;;  %v47_v54 = vpack.c.bf16 %v40_v51, %v40_v51  ;;  %v1013_v55 = vld [vmem:[%s1353_s1 + $0x108] sm:$0xff]  ;;  %v1012_v57 = vld [vmem:[%s1353_s1 + $0x100] sm:$0xff] }
  0x1e   :  { %455 = vmatpush.bf16.msra.mxu0 %v980_v27  ;;  %v1022_v53 = vld [vmem:[%s1353_s1 + $0x150] sm:$0xff]  ;;  %v1021_v56 = vld [vmem:[%s1353_s1 + $0x148] sm:$0xff]  ;;  %v1020_v58 = vld [vmem:[%s1353_s1 + $0x140] sm:$0xff] }
  0x1f   :  { %468 = vmatpush.bf16.msra.mxu1 %v988_v29  ;;  %v38_v59 = vld [vmem:[%s1352_s0 + $0x20] sm:$0xff]  ;;  %v39_v60 = vld [vmem:[%s1352_s0 + $0x28] sm:$0xff]  ;;  %v1032_v63 = vld [vmem:[%s1355_s3 + $0x18] sm:$0xff]  ;;  %s723_s0 = sshll.u32 %s1361_s9, 4  ;;  %s724_s0 = int_to_ptr.hbm [resolvable:$true] %s723_s0 }
  0x20   :  { %481 = vmatpush.bf16.msra.mxu2 %v996_v34  ;;  %v45_v61 = vpack.c.bf16 %v38_v59, %v38_v59  ;;  %v46_v62 = vpack.c.bf16 %v39_v60, %v39_v60  ;;  %v1031_v0 = vld [vmem:[%s1355_s3 + $0x10] sm:$0xff]  ;;  %v1030_v1 = vld [vmem:[%s1355_s3 + $0x8] sm:$0xff]  ;;  %v1029_v4 = vld [vmem:[%s1355_s3] sm:$0xff] }
  0x21   :  { %456 = vmatmul.bf16.vlgmr.msra.gmra.mxu0 %v41_v36  ;;  %494 = vmatpush.bf16.msra.mxu3 %v1004_v38  ;;  %v1036_v7 = vld [vmem:[%s1357_s5 + $0x18] sm:$0xff]  ;;  %v1035_v10 = vld [vmem:[%s1357_s5 + $0x10] sm:$0xff]  ;;  %v1042_v11 = vld [vmem:[%s1354_s2] ss:$0 sm:$0xff] }
  0x22   :  { %500 = vmatpush.bf16.msrb.mxu0 %v1019_v32  ;;  %469 = vmatmul.bf16.vlgmr.msra.gmra.mxu1 %v42_v37  ;;  %v1034_v12 = vld [vmem:[%s1357_s5 + $0x8] sm:$0xff]  ;;  %v1033_v30 = vld [vmem:[%s1357_s5] sm:$0xff]  ;;  %v1040_v31 = vld [vmem:[%s1359_s7 + $0x18] sm:$0xff] }
  0x23   :  { %513 = vmatpush.bf16.msrb.mxu1 %v1027_v33  ;;  %482 = vmatmul.bf16.vlgmr.msra.gmra.mxu2 %v43_v43  ;;  %v1039_v32 = vld [vmem:[%s1359_s7 + $0x10] sm:$0xff]  ;;  %v1038_v33 = vld [vmem:[%s1359_s7 + $0x8] sm:$0xff]  ;;  %v1043_v34 = vld [vmem:[%s1356_s4] ss:$0 sm:$0xff] }
  0x24   :  { %533 = vmatpush.bf16.msrb.mxu2 %v1028_v39  ;;  %495 = vmatmul.bf16.vlgmr.msra.gmra.mxu3 %v44_v44  ;;  %v1037_v40 = vld [vmem:[%s1359_s7] sm:$0xff] }
  0x25   :  { %585 = vmatpush.bf16.msrb.mxu3 %v1032_v63 }
  0x26   :  { %501 = vmatpush.bf16.msrb.mxu0 %v1018_v41  ;;  %v1044_v41 = vld [vmem:[%s1358_s6] ss:$0 sm:$0xff]  ;;  %s1076_s6 = smov [#allocation2]  }
  0x27   :  { %514 = vmatpush.bf16.msrb.mxu1 %v1026_v42  ;;  %s721_s7 = sshll.u32 %s1076_s6, 4  ;;  %s722_s7 = int_to_ptr.vmem [resolvable:$true] %s721_s7 }
  0x28   :  { %639 = vmatpush.bf16.msra.mxu2 %v1036_v7 }
  0x29   :  { %586 = vmatpush.bf16.msrb.mxu3 %v1031_v0 }
  0x2a   :  { %502 = vmatpush.bf16.msrb.mxu0 %v1017_v45 }
  0x2b   :  { %515 = vmatpush.bf16.msrb.mxu1 %v1025_v46 }
  0x2c   :  { %640 = vmatpush.bf16.msra.mxu2 %v1035_v10 }
  0x2d   :  { %587 = vmatpush.bf16.msrb.mxu3 %v1030_v1 }
  0x2e   :  { %503 = vmatpush.bf16.msrb.mxu0 %v1016_v47  ;;  %v1045_v47 = vld [vmem:[%s1360_s8] ss:$0 sm:$0xff] }
  0x2f   :  { %516 = vmatpush.bf16.msrb.mxu1 %v1024_v48 }
  0x30   :  { %641 = vmatpush.bf16.msra.mxu2 %v1034_v12 }
  0x31   :  { %588 = vmatpush.bf16.msrb.mxu3 %v1029_v4 }
  0x32   :  { %504 = vmatpush.bf16.msrb.mxu0 %v1015_v49 }
  0x33   :  { %517 = vmatpush.bf16.msrb.mxu1 %v1023_v50  ;;  %928 = vmatmul.msk.bf16.vlgmr.msrb.gmra.mxu2 %vm444_vm0, %v47_v54 }
  0x34   :  { %642 = vmatpush.bf16.msra.mxu2 %v1033_v30 }
  0x35   :  { %693 = vmatpush.bf16.msra.mxu3 %v1040_v31 }
  0x36   :  { %505 = vmatpush.bf16.msrb.mxu0 %v1014_v52 }
  0x37   :  { %518 = vmatpush.bf16.msrb.mxu1 %v1022_v53 }
  0x39   :  { %694 = vmatpush.bf16.msra.mxu3 %v1039_v32 }
  0x3a   :  { %506 = vmatpush.bf16.msrb.mxu0 %v1013_v55 }
  0x3b   :  { %519 = vmatpush.bf16.msrb.mxu1 %v1021_v56 }
  0x3d   :  { %695 = vmatpush.bf16.msra.mxu3 %v1038_v33 }
  0x3e   :  { %507 = vmatpush.bf16.msrb.mxu0 %v1012_v57 }
  0x3f   :  { %520 = vmatpush.bf16.msrb.mxu1 %v1020_v58 }
  0x41   :  { %508 = vmatmul.bf16.vlgmr.msrb.gmra.mxu0 %v45_v61  ;;  %696 = vmatpush.bf16.msra.mxu3 %v1037_v40 }
  0x42   :  { %521 = vmatmul.bf16.vlgmr.msrb.gmra.mxu1 %v46_v62 }
  0x9e   :  { %v457_v2 = vpop.f32.mrf.mxu0 }
  0x9f   :  { %v470_v3 = vpop.f32.mrf.mxu1  ;;  %v458_v13 = vadd.f32 %v1042_v11, %v457_v2 }
  0xa1   :  { %v471_v16 = vadd.f32 %v470_v3, %v458_v13 }
  0xa6   :  { %v459_v5 = vpop.f32.mrf.mxu0  ;;  %v483_v8 = vpop.f32.mrf.mxu2 }
  0xa7   :  { %v472_v6 = vpop.f32.mrf.mxu1  ;;  %v496_v9 = vpop.f32.mrf.mxu3  ;;  %v484_v17 = vadd.f32 %v483_v8, %v471_v16 }
  0xa9   :  { %v497_v19 = vadd.f32 %v496_v9, %v484_v17 }
  0xae   :  { %v485_v14 = vpop.f32.mrf.mxu2 }
  0xaf   :  { %v498_v15 = vpop.f32.mrf.mxu3 }
  0xb6   :  { %v535_v18 = vpop.f32.mrf.mxu2 }
  0xbe   :  { %v509_v20 = vpop.f32.mrf.mxu0  ;;  %v537_v24 = vpop.f32.mrf.mxu2 }
  0xbf   :  { %v522_v21 = vpop.f32.mrf.mxu1  ;;  %v510_v22 = vadd.f32 %v509_v20, %v497_v19 }
  0xc1   :  { %v523_v23 = vadd.f32 %v522_v21, %v510_v22 }
  0xc3   :  { %v536_v25 = vadd.f32 %v535_v18, %v523_v23 }
  0xc5   :  { %v539_v26 = vmax.f32 %v536_v25, 0.0 }
  0xc6   :  { %v511_v27 = vpop.f32.mrf.mxu0 }
  0xc7   :  { %v524_v28 = vpop.f32.mrf.mxu1  ;;  %v540_v29 = vpack.c.bf16 %v539_v26, %v539_v26 }
  0xc9   :  { %945 = vmatmul.msk.bf16.vlgmr.msrb.gmra.mxu3 %vm577_vm1, %v540_v29 }
 0x14c   :  { %v590_v35 = vpop.f32.mrf.mxu3 }
 0x14d   :  { %v591_v36 = vadd.f32 %v1043_v34, %v590_v35 }
 0x14f   :  { %v594_v37 = vmax.f32 %v591_v36, 0.0 }
 0x151   :  { %v595_v38 = vpack.c.bf16 %v594_v37, %v594_v37 }
 0x153   :  { %962 = vmatmul.msk.bf16.vlgmr.msra.gmra.mxu2 %vm577_vm1, %v595_v38 }
 0x154   :  { %v592_v39 = vpop.f32.mrf.mxu3 }
 0x1d6   :  { %v644_v42 = vpop.f32.mrf.mxu2 }
 0x1d7   :  { %v645_v43 = vadd.f32 %v1044_v41, %v644_v42 }
 0x1d9   :  { %v648_v44 = vmax.f32 %v645_v43, 0.0 }
 0x1db   :  { %v649_v45 = vpack.c.bf16 %v648_v44, %v648_v44 }
 0x1dd   :  { %979 = vmatmul.msk.bf16.vlgmr.msra.gmra.mxu3 %vm577_vm1, %v649_v45 }
 0x1de   :  { %v646_v46 = vpop.f32.mrf.mxu2 }
 0x260   :  { %v698_v48 = vpop.f32.mrf.mxu3 }
 0x261   :  { %v699_v49 = vadd.f32 %v1045_v47, %v698_v48 }
 0x263   :  { %v703_v50 = vsel %vm702_vm2, %v699_v49, -inf }
 0x264   :  { %704 = vmax.xlane.f32.xlu0 %v703_v50 }
 0x268   :  { %v700_v51 = vpop.f32.mrf.mxu3 }
 0x2d7   :  { %v705_v52 = vpop.xlane.xlu0 %704 }
 0x2d8   :  { %v706_v53 = vsub.f32 %v699_v49, %v705_v52 }
 0x2da   :  { %v707_v54 = vmul.f32 1.442695, %v706_v53 }
 0x2dc   :  { %1046 = vpow2.f32 %v707_v54 }
 0x2e2   :  { %v1047_v55 = vpop.eup %1046 }
 0x2e3   :  { %v709_v56 = vsel %vm702_vm2, %v1047_v55, 0.0 }
 0x2e4   :  { %710 = vadd.xlane.f32.xlu0 %v709_v56 }
 0x357   :  { %v711_v57 = vpop.xlane.xlu0 %710 }
 0x358   :  { %1048 = vlog2.f32 %v711_v57 }
 0x35e   :  { %v1049_v58 = vpop.eup %1048 }
 0x35f   :  { %v713_v59 = vmul.f32 0.6931472, %v1049_v58 }
 0x361   :  { %v714_v60 = vsub.f32 %v706_v53, %v713_v59 }
 0x363   :  { %715 = vst.msk [vmem:[#allocation2] sm:$0xff] %vm702_vm2, %v714_v60 }
 0x364   :  { %726 = dma.vmem_to_hbm [thread:$0]  %s722_s7, 128, %s724_s0, [#allocation3]  }
 0x365   :  { %1074 = dma.done.wait [#allocation3], 128  }
 0x366   :  { %1075 = vsyncadd [#allocation3], 4294967168 }
 0x367   :  { %731 = vsyncpa [#allocation3], 1 }

</bundles_post_ra>
